<compile_context>
chip_gen: v5e
topology: v5e:2x2
jax: 0.10.0
libtpu: 0.0.40
codegen_flags: <defaults>
</compile_context>

<pallas_src>
import jax
import jax.numpy as jnp
from jax import lax
from jax.experimental import pallas as pl
from jax.experimental.pallas import tpu as pltpu

_LANES = 512  # lane-dense minor dim (multiple of 128)


def _make_kernel(rows, lanes, num_blocks, valid_rows_last):
    needs_mask = valid_rows_last != rows

    def _fold(x):
        # (rows, lanes) f32 -> (8, lanes): leading-axis fold over row groups.
        # Splitting the sublane dim by its native factor of 8 keeps the vreg
        # layout, so this lowers to pure vreg-wise VPU adds (no XLU).
        return jnp.sum(x.reshape(rows // 8, 8, lanes), axis=0)

    def kernel(y_pred_ref, y_true_ref, out_ref):
        # Native-dtype loads, in-kernel upcast (bf16 stays bf16 in HBM).
        yt = y_true_ref[...].astype(jnp.float32)
        yp = y_pred_ref[...].astype(jnp.float32)
        # Exact divide: kernel is HBM-bandwidth bound, so the divide is free
        # and matches the PyTorch reference (no approx-reciprocal error).
        ape = jnp.abs(yt - yp) / (jnp.abs(yt) + jnp.float32(1e-6))

        if needs_mask:
            i = pl.program_id(0)
            last = num_blocks - 1

            @pl.when(i != last)
            def _():
                out_ref[...] = _fold(ape)

            @pl.when(i == last)
            def _():
                # Mask only the Pallas out-of-bounds rows of the final block.
                rid = lax.broadcasted_iota(jnp.int32, ape.shape, 0)
                out_ref[...] = _fold(
                    jnp.where(rid < valid_rows_last, ape, jnp.float32(0.0)))
        else:
            out_ref[...] = _fold(ape)

    return kernel


def _default_tile_bytes():
    try:
        kind = jax.devices()[0].device_kind.lower()
    except Exception:
        return 2 << 20
    if "v5" in kind or "v6" in kind:
        return 4 << 20   # 128 MiB physical VMEM: bigger streaming tiles help
    return 2 << 20       # v7x & unknown: 64 MiB physical / 32 MiB scoped


def mape_loss(y_pred: jax.Array, y_true: jax.Array, *,
              target_tile_bytes: int | None = None,
              min_kernel_bytes: int = 1 << 20) -> jax.Array:
    """MAPE loss, semantics identical to the PyTorch MAPELoss.forward."""
    assert y_pred.shape == y_true.shape, (y_pred.shape, y_true.shape)
    if y_pred.dtype != y_true.dtype:
        common = jnp.promote_types(y_pred.dtype, y_true.dtype)
        y_pred = y_pred.astype(common)
        y_true = y_true.astype(common)

    n = y_pred.size                     # true element count (mean denominator)
    itemsize = jnp.dtype(y_pred.dtype).itemsize

    # Tiny-input fallback: a single small block makes pallas_call dispatch /
    # pipeline overhead dominate; XLA's fused elementwise+reduce wins.
    if n * itemsize < min_kernel_bytes:
        yt = y_true.astype(jnp.float32)
        yp = y_pred.astype(jnp.float32)
        return jnp.mean(jnp.abs(yt - yp) / (jnp.abs(yt) + 1e-6)) * 100.0

    if target_tile_bytes is None:
        target_tile_bytes = _default_tile_bytes()

    lanes = _LANES
    yp = jnp.reshape(y_pred, (-1,))
    yt = jnp.reshape(y_true, (-1,))
    # Zero-pad to a multiple of 8*lanes (zeros contribute exactly 0 to the
    # sum, so the true-count scale 100/n below stays exact).
    pad_to = 8 * lanes
    rem = n % pad_to
    if rem:
        pad = pad_to - rem
        yp = jnp.concatenate([yp, jnp.zeros((pad,), yp.dtype)])
        yt = jnp.concatenate([yt, jnp.zeros((pad,), yt.dtype)])
    m = yp.size // lanes                # rows of the (M, lanes) view, mult of 8
    yp = yp.reshape(m, lanes)
    yt = yt.reshape(m, lanes)

    # Row tile: biggest sublane-aligned multiple that fits the per-input byte
    # target, or the full extent if the input is smaller than that.
    row_align = 8 * max(1, 4 // itemsize)     # 8 rows f32, 16 bf16, 32 int8
    target_rows = max(1, target_tile_bytes // (lanes * itemsize))
    if target_rows >= m:
        rows = m
    else:
        rows = (target_rows // row_align) * row_align
        if rows == 0:
            rows = m
    num_blocks = pl.cdiv(m, rows)
    valid_rows_last = m - (num_blocks - 1) * rows

    kernel = _make_kernel(rows, lanes, num_blocks, valid_rows_last)

    # vmem limit derived from the actual double-buffered footprint
    # (2 inputs x 2 buffers x tile) + output buffers + headroom.
    in_tile_bytes = rows * lanes * itemsize
    out_tile_bytes = 8 * lanes * 4
    vmem_limit = 2 * 2 * in_tile_bytes + 2 * out_tile_bytes + (4 << 20)
    vmem_limit = int(min(max(vmem_limit, 16 << 20), 64 << 20))

    partials = pl.pallas_call(
        kernel,
        out_shape=jax.ShapeDtypeStruct((num_blocks * 8, lanes), jnp.float32),
        grid_spec=pltpu.PrefetchScalarGridSpec(
            num_scalar_prefetch=0,
            grid=(num_blocks,),
            in_specs=[
                pl.BlockSpec((rows, lanes), lambda i: (i, 0)),
                pl.BlockSpec((rows, lanes), lambda i: (i, 0)),
            ],
            out_specs=pl.BlockSpec((8, lanes), lambda i: (i, 0)),
        ),
        compiler_params=pltpu.CompilerParams(
            # Independent per-block partial sums: "parallel" lets v7x shard
            # the HBM stream across both TensorCores; neutral on v5e/v6e.
            dimension_semantics=("parallel",),
            vmem_limit_bytes=vmem_limit,
        ),
    )(yp, yt)

    # Finalize: tiny reduce over num_blocks*8*lanes partials, scale by 100/N.
    return jnp.sum(partials) * jnp.float32(100.0 / n)


if __name__ == "__main__":
    key = jax.random.PRNGKey(0)
    k1, k2, k3, k4 = jax.random.split(key, 4)

    def ref_mape(yp, yt):
        yt = yt.astype(jnp.float32)
        yp = yp.astype(jnp.float32)
        return jnp.mean(jnp.abs((yt - yp) / (jnp.abs(yt) + 1e-6))) * 100.0

    # 1) Small f32 forecasting shape; force the Pallas path (the default
    #    wrapper would route this tiny input to the jnp fallback).
    y_true = jax.random.normal(k1, (16, 128), dtype=jnp.float32)
    y_pred = y_true + 0.1 * jax.random.normal(k2, (16, 128), dtype=jnp.float32)
    loss = mape_loss(y_pred, y_true, min_kernel_bytes=0)
    jax.block_until_ready(loss)
    assert jnp.allclose(loss, ref_mape(y_pred, y_true), rtol=1e-4), (
        loss, ref_mape(y_pred, y_true))

    # 2) bf16 inputs, horizon not a multiple of 128, small tile target so the
    #    last row-block is partial (exercises zero-pad + pl.when tail mask).
    yt2_f32 = jax.random.normal(k3, (100, 96), dtype=jnp.float32)
    yp2_f32 = yt2_f32 + 0.05 * jax.random.normal(k4, (100, 96), dtype=jnp.float32)
    yt2 = yt2_f32.astype(jnp.bfloat16)
    yp2 = yp2_f32.astype(jnp.bfloat16)
    loss2 = mape_loss(yp2, yt2, min_kernel_bytes=0, target_tile_bytes=16 * 1024)
    jax.block_until_ready(loss2)
    assert jnp.allclose(loss2, ref_mape(yp2, yt2), rtol=1e-4), (
        loss2, ref_mape(yp2, yt2))

    # 3) Default routing on a tiny input (jnp fallback path).
    loss3 = mape_loss(y_pred, y_true)
    jax.block_until_ready(loss3)
    assert jnp.allclose(loss3, ref_mape(y_pred, y_true), rtol=1e-4), loss3

    print("KERNEL_OK")
</pallas_src>

<mosaic_0001>
module attributes {stable_mosaic.version = 11 : i64} {
  func.func @kernel(%arg0: i32, %arg1: memref<8x512xf32, #tpu.memory_space<vmem>>, %arg2: memref<8x512xf32, #tpu.memory_space<vmem>>, %arg3: memref<8x512xf32, #tpu.memory_space<vmem>>) attributes {dimension_semantics = [#tpu.dimension_semantics<parallel>], iteration_bounds = array<i64: 1>, scalar_prefetch = 0 : i64, scratch_operands = 0 : i64, tpu.core_type = #tpu.core_type<tc>, window_params = [{transform_indices = @transform_0, window_bounds = array<i64: 8, 512>}, {transform_indices = @transform_1, window_bounds = array<i64: 8, 512>}, {transform_indices = @transform_2, window_bounds = array<i64: 8, 512>}]} {
    %c0 = arith.constant 0 : index
    %c0_0 = arith.constant 0 : index
    %0 = vector.load %arg2[%c0, %c0_0] : memref<8x512xf32, #tpu.memory_space<vmem>>, vector<8x512xf32>
    %c0_1 = arith.constant 0 : index
    %c0_2 = arith.constant 0 : index
    %1 = vector.load %arg1[%c0_1, %c0_2] : memref<8x512xf32, #tpu.memory_space<vmem>>, vector<8x512xf32>
    %2 = arith.subf %0, %1 : vector<8x512xf32>
    %3 = math.absf %2 : vector<8x512xf32>
    %4 = math.absf %0 : vector<8x512xf32>
    %cst = arith.constant 9.99999997E-7 : f32
    %5 = vector.broadcast %cst : f32 to vector<8x512xf32>
    %6 = arith.addf %4, %5 : vector<8x512xf32>
    %7 = arith.divf %3, %6 : vector<8x512xf32>
    %8 = vector.shape_cast %7 : vector<8x512xf32> to vector<1x8x512xf32>
    %cst_3 = arith.constant dense<0.000000e+00> : vector<8x512xf32>
    %9 = vector.multi_reduction <add>, %8, %cst_3 [0] : vector<1x8x512xf32> to vector<8x512xf32>
    %c0_4 = arith.constant 0 : index
    %c0_5 = arith.constant 0 : index
    %10 = vector.load %arg3[%c0_4, %c0_5] : memref<8x512xf32, #tpu.memory_space<vmem>>, vector<8x512xf32>
    tpu.vector_store %arg3[%c0_4, %c0_5], %9 {strides = array<i32>} : memref<8x512xf32, #tpu.memory_space<vmem>>, vector<8x512xf32>,
    return
  }
  func.func @transform_0(%arg0: i32) -> (i32, i32) {
    %c0_i32 = arith.constant 0 : i32
    %c0_i32_0 = arith.constant 0 : i32
    return %arg0, %c0_i32 : i32, i32
  }
  func.func @transform_1(%arg0: i32) -> (i32, i32) {
    %c0_i32 = arith.constant 0 : i32
    %c0_i32_0 = arith.constant 0 : i32
    return %arg0, %c0_i32 : i32, i32
  }
  func.func @transform_2(%arg0: i32) -> (i32, i32) {
    %c0_i32 = arith.constant 0 : i32
    %c0_i32_0 = arith.constant 0 : i32
    return %arg0, %c0_i32 : i32, i32
  }
}

</mosaic_0001>

<bundles_post_ra>
// kernel: tpu_custom_call.1
= control target key start
LH: loop header
LB: loop body
LE: loop exit
PB: predicated region body
PF: predicated region fallthrough
CT: control target
= control target key end

     0   :  { %7 = vsyncpa [#allocation3], 0  ;;  %s320_s0 = inlined_call_operand.hbm [shape: f32[8,512], index: 0, kind: input, shape index: {}]   ;;  %s321_s1 = inlined_call_operand.hbm [shape: f32[8,512], index: 1, kind: input, shape index: {}]   ;;  %s322_s2 = inlined_call_operand.hbm [shape: f32[8,512], index: 2, kind: output, shape index: {}]  }
   0x1   :  { %8 = vsyncpa [#allocation6], 0 }
   0x2   :  { %9 = vsyncpa [#allocation4], 0  ;;  %s15_s11 = sshll.u32 %s320_s0, 4  ;;  %s239_s12 = smov [#allocation2]   ;;  %s16_s11 = int_to_ptr.hbm [resolvable:$true] %s15_s11 }
   0x3   :  { %s17_s13 = sshll.u32 %s239_s12, 4  ;;  %s26_s16 = sshll.u32 %s321_s1, 4  ;;  %s18_s13 = int_to_ptr.vmem [resolvable:$true] %s17_s13  ;;  %s27_s16 = int_to_ptr.hbm [resolvable:$true] %s26_s16 }
   0x4   :  { %20 = dma.hbm_to_vmem [thread:$0]  %s16_s11, 512, %s18_s13, [#allocation3]  }
   0x5   :  { %s240_s17 = smov [#allocation5]  }
   0x6   :  { %s28_s18 = sshll.u32 %s240_s17, 4  ;;  %s29_s18 = int_to_ptr.vmem [resolvable:$true] %s28_s18 }
   0x7   :  { %31 = dma.hbm_to_vmem [thread:$0]  %s27_s16, 512, %s29_s18, [#allocation6]  }
   0x8   :  { %233 = dma.done.wait [#allocation3], 512  }
   0x9   :  { %234 = vsyncadd [#allocation3], 4294966784 }
   0xa   :  { %235 = dma.done.wait [#allocation6], 512  }
   0xb   :  { %236 = vsyncadd [#allocation6], 4294966784  ;;  %v40_v0 = vld [vmem:[#allocation5] sm:$0xff]  ;;  %v41_v1 = vld [vmem:[#allocation5 + $0x8] sm:$0xff]  ;;  %s241_s0 = smov [#allocation7]   ;;  %s139_s21 = sshll.u32 %s322_s2, 4  ;;  %s140_s21 = int_to_ptr.hbm [resolvable:$true] %s139_s21 }
   0xc   :  { %v56_v2 = vand.u32 2147483647, %v40_v0  ;;  %v57_v3 = vand.u32 2147483647, %v41_v1  ;;  %v42_v4 = vld [vmem:[#allocation5 + $0x10] sm:$0xff]  ;;  %v263_v6 = vld [vmem:[#allocation5 + $0x18] sm:$0xff] }
   0xd   :  { %v58_v5 = vand.u32 2147483647, %v42_v4  ;;  %v44_v7 = vld [vmem:[#allocation2] sm:$0xff]  ;;  %v45_v10 = vld [vmem:[#allocation2 + $0x8] sm:$0xff]  ;;  %v59_v12 = vand.u32 2147483647, %v263_v6 }
   0xe   :  { %v60_v8 = vadd.f32 1e-06, %v56_v2  ;;  %v61_v9 = vadd.f32 1e-06, %v57_v3  ;;  %v48_v13 = vsub.f32 %v40_v0, %v44_v7  ;;  %v49_v14 = vsub.f32 %v41_v1, %v45_v10  ;;  %v46_v15 = vld [vmem:[#allocation2 + $0x10] sm:$0xff]  ;;  %v266_v16 = vld [vmem:[#allocation2 + $0x18] sm:$0xff] }
   0xf   :  { %v62_v11 = vadd.f32 1e-06, %v58_v5  ;;  %v268_v18 = vadd.f32 1e-06, %v59_v12  ;;  %v50_v20 = vsub.f32 %v42_v4, %v46_v15  ;;  %v51_v24 = vsub.f32 %v263_v6, %v266_v16  ;;  %s137_s1 = sshll.u32 %s241_s0, 4  ;;  %s138_s1 = int_to_ptr.vmem [resolvable:$true] %s137_s1 }
  0x10   :  { %153 = vrcp.f32 %v60_v8  ;;  %v73_v17 = vand.u32 2147483647, %v60_v8  ;;  %v52_v19 = vand.u32 2147483647, %v48_v13  ;;  %v75_v22 = vand.u32 2147483648, %v60_v8 }
  0x11   :  { %155 = vrcp.f32 %v61_v9  ;;  %v53_v23 = vand.u32 2147483647, %v49_v14  ;;  %vm69_vm0 = vweird.f32 %v60_v8  ;;  %vm84_vm1 = vweird.f32 %v61_v9 }
  0x12   :  { %157 = vrcp.f32 %v62_v11  ;;  %v88_v27 = vand.u32 2147483647, %v61_v9  ;;  %vm273_vm2 = vcmp.eq.f32.partialorder %v73_v17, 8.507059e+37  ;;  %v90_v31 = vand.u32 2147483648, %v61_v9 }
  0x13   :  { %159 = vrcp.f32 %v268_v18  ;;  %v103_v32 = vand.u32 2147483647, %v62_v11  ;;  %v105_v35 = vand.u32 2147483648, %v62_v11  ;;  %v76_v36 = vor.u32 1.1754944e-38, %v75_v22 }
  0x14   :  { %v54_v38 = vand.u32 2147483647, %v50_v20  ;;  %vm99_vm5 = vweird.f32 %v62_v11  ;;  %vm282_vm8 = vcmp.eq.f32.partialorder %v88_v27, 8.507059e+37  ;;  %v91_v45 = vor.u32 1.1754944e-38, %v90_v31 }
  0x15   :  { %vm286_vm9 = vcmp.eq.f32.partialorder %v103_v32, 8.507059e+37  ;;  %v106_v50 = vor.u32 1.1754944e-38, %v105_v35  ;;  %vm114_vm12 = vweird.f32 %v268_v18  ;;  %v118_v54 = vand.u32 2147483647, %v268_v18 }
  0x16   :  { %v154_v21 = vpop.eup %153  ;;  %v120_v55 = vand.u32 2147483648, %v268_v18  ;;  %v55_v5 = vand.u32 2147483647, %v51_v24 }
  0x17   :  { %v156_v25 = vpop.eup %155  ;;  %v65_v26 = vmul.f32 %v154_v21, %v60_v8  ;;  %vm70_vm3 = vweird.f32 %v154_v21  ;;  %vm119_vm15 = vcmp.eq.f32.partialorder %v118_v54, 8.507059e+37 }
  0x18   :  { %v158_v28 = vpop.eup %157  ;;  %v80_v30 = vmul.f32 %v156_v25, %v61_v9  ;;  %vm85_vm4 = vweird.f32 %v156_v25  ;;  %vm278_vm7 = vmor %vm69_vm0, %vm70_vm3  ;;  %v121_v3 = vor.u32 1.1754944e-38, %v120_v55 }
  0x19   :  { %v66_v33 = vsub.f32 1.0, %v65_v26  ;;  %v95_v34 = vmul.f32 %v158_v28, %v62_v11  ;;  %vm100_vm6 = vweird.f32 %v158_v28  ;;  %v160_v41 = vpop.eup %159  ;;  %vm291_vm10 = vmor %vm84_vm1, %vm85_vm4 }
  0x1a   :  { %v81_v37 = vsub.f32 1.0, %v80_v30  ;;  %v110_v51 = vmul.f32 %v160_v41, %v268_v18  ;;  %vm296_vm11 = vmor %vm99_vm5, %vm100_vm6  ;;  %vm115_vm13 = vweird.f32 %v160_v41 }
  0x1b   :  { %v67_v39 = vmul.f32 %v154_v21, %v66_v33  ;;  %v96_v40 = vsub.f32 1.0, %v95_v34  ;;  %vm116_vm14 = vmor %vm114_vm12, %vm115_vm13 }
  0x1c   :  { %v82_v43 = vmul.f32 %v156_v25, %v81_v37  ;;  %v111_v58 = vsub.f32 1.0, %v110_v51 }
  0x1d   :  { %v68_v47 = vadd.f32 %v154_v21, %v67_v39  ;;  %v97_v49 = vmul.f32 %v158_v28, %v96_v40 }
  0x1e   :  { %v83_v52 = vadd.f32 %v156_v25, %v82_v43  ;;  %v112_v0 = vmul.f32 %v160_v41, %v111_v58 }
  0x1f   :  { %v72_v56 = vsel %vm278_vm7, %v154_v21, %v68_v47  ;;  %v98_v57 = vadd.f32 %v158_v28, %v97_v49 }
  0x20   :  { %v77_v59 = vsel %vm273_vm2, %v76_v36, %v72_v56  ;;  %v87_v60 = vsel %vm291_vm10, %v156_v25, %v83_v52  ;;  %v113_v6 = vadd.f32 %v160_v41, %v112_v0 }
  0x21   :  { %v78_v61 = vmul.f32 %v77_v59, %v52_v19  ;;  %v92_v62 = vsel %vm282_vm8, %v91_v45, %v87_v60  ;;  %v102_v63 = vsel %vm296_vm11, %v158_v28, %v98_v57 }
  0x22   :  { %v93_v1 = vmul.f32 %v92_v62, %v53_v23  ;;  %v107_v2 = vsel %vm286_vm9, %v106_v50, %v102_v63  ;;  %v117_v7 = vsel %vm116_vm14, %v160_v41, %v113_v6 }
  0x23   :  { %128 = vst [vmem:[#allocation7] sm:$0xff] %v78_v61  ;;  %v108_v4 = vmul.f32 %v107_v2, %v54_v38  ;;  %v122_v8 = vsel %vm119_vm15, %v121_v3, %v117_v7 }
  0x24   :  { %129 = vst [vmem:[#allocation7 + $0x8] sm:$0xff] %v93_v1  ;;  %v123_v9 = vmul.f32 %v122_v8, %v55_v5 }
  0x25   :  { %130 = vst [vmem:[#allocation7 + $0x10] sm:$0xff] %v108_v4 }
  0x26   :  { %131 = vst [vmem:[#allocation7 + $0x18] sm:$0xff] %v123_v9 }
  0x27   :  { %142 = dma.vmem_to_hbm [thread:$0]  %s138_s1, 512, %s140_s21, [#allocation4]  }
  0x28   :  { %237 = dma.done.wait [#allocation4], 512  }
  0x29   :  { %238 = vsyncadd [#allocation4], 4294966784 }
  0x2a   :  { %147 = vsyncpa [#allocation3], 1 }
  0x2b   :  { %148 = vsyncpa [#allocation6], 1 }
  0x2c   :  { %149 = vsyncpa [#allocation4], 1 }

</bundles_post_ra>
